<compile_context>
chip_gen: v7x
topology: tpu7x:2x2x1
jax: 0.10.0
libtpu: 0.0.40
codegen_flags: <defaults>
</compile_context>

<pallas_src>
import jax
import jax.numpy as jnp
from jax import lax
from jax.experimental import pallas as pl
from jax.experimental.pallas import tpu as pltpu

LANES = 128
CHUNK_ROWS = 256        # rows per in-kernel accumulation chunk (multiple of 8)
MAX_BLOCK_ROWS = 4096   # 4096 x 128 x 4B = 2 MiB per f32 input per buffer


def _bce_elementwise(x, t):
    """Numerically stable BCE-with-logits, elementwise (f32)."""
    x = x.astype(jnp.float32)
    t = t.astype(jnp.float32)
    return jnp.maximum(x, 0.0) - x * t + jnp.log1p(jnp.exp(-jnp.abs(x)))


def _choose_tiling(rows):
    """Pick (block_rows, chunk_rows, num_blocks, need_mask) for rows >= 8."""
    # Aim for >= 2 grid blocks when possible so ("parallel",) uses both v7x
    # TensorCores; cap the block so double-buffered inputs stay small.
    target = pl.cdiv(rows, 2) if rows >= 16 else rows
    if target > CHUNK_ROWS:
        block_rows = min(MAX_BLOCK_ROWS, pl.cdiv(target, CHUNK_ROWS) * CHUNK_ROWS)
    else:
        block_rows = pl.cdiv(target, 8) * 8
    block_rows = min(block_rows, (rows // 8) * 8)   # never exceed the array dim
    chunk_rows = min(CHUNK_ROWS, block_rows)
    while block_rows % chunk_rows:                   # keep chunk a divisor
        chunk_rows -= 8
    num_blocks = pl.cdiv(rows, block_rows)
    need_mask = (rows % block_rows) != 0
    return block_rows, chunk_rows, num_blocks, need_mask


def _make_bce_partial_kernel(block_rows, chunk_rows, valid_rows, need_mask):
    """Kernel producing one (8, 128) f32 partial sum per grid block."""
    n_chunks = block_rows // chunk_rows

    def kernel(x_ref, t_ref, out_ref):
        i = pl.program_id(0)

        def chunk_partial(r0, masked):
            x = x_ref[pl.ds(r0, chunk_rows), :].astype(jnp.float32)
            t = t_ref[pl.ds(r0, chunk_rows), :].astype(jnp.float32)
            loss = jnp.maximum(x, 0.0) - x * t + jnp.log1p(jnp.exp(-jnp.abs(x)))
            if masked:
                row = (i * block_rows + r0
                       + lax.broadcasted_iota(jnp.int32, (chunk_rows, LANES), 0))
                loss = jnp.where(row < valid_rows, loss, 0.0)
            # Pure-VPU vreg adds: fold row chunks onto an (8, 128) slab.
            return loss.reshape(-1, 8, LANES).sum(axis=0)

        def block_partial(masked):
            if n_chunks == 1:
                return chunk_partial(0, masked)

            def body(c, acc):
                r0 = pl.multiple_of(c * chunk_rows, chunk_rows)
                return acc + chunk_partial(r0, masked)

            return lax.fori_loop(0, n_chunks, body,
                                 jnp.zeros((8, LANES), jnp.float32),
                                 unroll=True)

        if need_mask:
            last = pl.num_programs(0) - 1

            @pl.when(i < last)
            def _():
                out_ref[...] = block_partial(False)

            @pl.when(i == last)
            def _():
                out_ref[...] = block_partial(True)
        else:
            out_ref[...] = block_partial(False)

    return kernel


@jax.jit
def bce_with_logits_loss(inputs, targets):
    """Mean-reduced BCEWithLogitsLoss (raw logits) via a Pallas TPU kernel."""
    assert inputs.shape == targets.shape
    n = inputs.size
    assert n > 0, "BCE loss of an empty tensor is undefined"

    xf = jnp.ravel(inputs)
    tf = jnp.ravel(targets)

    rows = n // LANES
    total = jnp.float32(0.0)
    main = 0

    if rows >= 8:
        main = rows * LANES
        # Metadata-only when n is a multiple of 128 (the common case).
        x2 = xf[:main].reshape(rows, LANES)
        t2 = tf[:main].reshape(rows, LANES)

        block_rows, chunk_rows, num_blocks, need_mask = _choose_tiling(rows)
        kernel = _make_bce_partial_kernel(block_rows, chunk_rows, rows, need_mask)
        in_spec = pl.BlockSpec((block_rows, LANES), lambda i: (i, 0))

        partials = pl.pallas_call(
            kernel,
            out_shape=jax.ShapeDtypeStruct((num_blocks * 8, LANES), jnp.float32),
            grid_spec=pltpu.PrefetchScalarGridSpec(
                num_scalar_prefetch=0,
                grid=(num_blocks,),
                in_specs=[in_spec, in_spec],
                out_specs=pl.BlockSpec((8, LANES), lambda i: (i, 0)),
            ),
            compiler_params=pltpu.CompilerParams(
                dimension_semantics=("parallel",),
                vmem_limit_bytes=16 << 20,
            ),
        )(x2, t2)

        total = total + jnp.sum(partials)

    if main < n:
        # Sub-128-element ragged tail (or tiny inputs): plain JAX, negligible.
        total = total + jnp.sum(_bce_elementwise(xf[main:], tf[main:]))

    return (total / jnp.float32(n)).astype(jnp.float32)


if __name__ == "__main__":
    key = jax.random.PRNGKey(0)
    k1, k2 = jax.random.split(key)

    # Small segmentation-style NCHW shapes (logits + binary targets).
    inputs = jax.random.normal(k1, (2, 4, 16, 16), dtype=jnp.float32)
    targets = (jax.random.uniform(k2, (2, 4, 16, 16)) > 0.5).astype(jnp.float32)

    loss = bce_with_logits_loss(inputs, targets)
    jax.block_until_ready(loss)

    # Reference in plain JAX (nn.BCEWithLogitsLoss, mean reduction).
    ref = jnp.mean(
        jnp.maximum(inputs, 0.0)
        - inputs * targets
        + jnp.log1p(jnp.exp(-jnp.abs(inputs)))
    )
    assert jnp.allclose(loss, ref, atol=1e-5, rtol=1e-5), (loss, ref)

    print("KERNEL_OK")
</pallas_src>

<mosaic_0001>
module attributes {stable_mosaic.version = 11 : i64} {
  func.func @kernel(%arg0: i32, %arg1: memref<8x128xf32, #tpu.memory_space<vmem>>, %arg2: memref<8x128xf32, #tpu.memory_space<vmem>>, %arg3: memref<8x128xf32, #tpu.memory_space<vmem>>) attributes {dimension_semantics = [#tpu.dimension_semantics<parallel>], iteration_bounds = array<i64: 2>, scalar_prefetch = 0 : i64, scratch_operands = 0 : i64, tpu.core_type = #tpu.core_type<tc>, window_params = [{transform_indices = @transform_0, window_bounds = array<i64: 8, 128>}, {transform_indices = @transform_1, window_bounds = array<i64: 8, 128>}, {transform_indices = @transform_2, window_bounds = array<i64: 8, 128>}]} {
    %c0 = arith.constant 0 : index
    %c0_0 = arith.constant 0 : index
    %0 = vector.load %arg1[%c0, %c0_0] : memref<8x128xf32, #tpu.memory_space<vmem>>, vector<8x128xf32>
    %c0_1 = arith.constant 0 : index
    %c0_2 = arith.constant 0 : index
    %1 = vector.load %arg2[%c0_1, %c0_2] : memref<8x128xf32, #tpu.memory_space<vmem>>, vector<8x128xf32>
    %cst = arith.constant 0.000000e+00 : f32
    %2 = vector.broadcast %cst : f32 to vector<8x128xf32>
    %3 = arith.maximumf %0, %2 : vector<8x128xf32>
    %4 = arith.mulf %0, %1 : vector<8x128xf32>
    %5 = arith.subf %3, %4 : vector<8x128xf32>
    %6 = math.absf %0 : vector<8x128xf32>
    %cst_3 = arith.constant 0.000000e+00 : f32
    %7 = vector.broadcast %cst_3 : f32 to vector<8x128xf32>
    %8 = arith.subf %7, %6 : vector<8x128xf32>
    %9 = math.exp %8 : vector<8x128xf32>
    %10 = math.log1p %9 : vector<8x128xf32>
    %11 = arith.addf %5, %10 : vector<8x128xf32>
    %12 = vector.shape_cast %11 : vector<8x128xf32> to vector<1x8x128xf32>
    %cst_4 = arith.constant dense<0.000000e+00> : vector<8x128xf32>
    %13 = vector.multi_reduction <add>, %12, %cst_4 [0] : vector<1x8x128xf32> to vector<8x128xf32>
    %c0_5 = arith.constant 0 : index
    %c0_6 = arith.constant 0 : index
    %14 = vector.load %arg3[%c0_5, %c0_6] : memref<8x128xf32, #tpu.memory_space<vmem>>, vector<8x128xf32>
    tpu.vector_store %arg3[%c0_5, %c0_6], %13 {strides = array<i32>} : memref<8x128xf32, #tpu.memory_space<vmem>>, vector<8x128xf32>,
    return
  }
  func.func @transform_0(%arg0: i32) -> (i32, i32) {
    %c0_i32 = arith.constant 0 : i32
    %c0_i32_0 = arith.constant 0 : i32
    return %arg0, %c0_i32 : i32, i32
  }
  func.func @transform_1(%arg0: i32) -> (i32, i32) {
    %c0_i32 = arith.constant 0 : i32
    %c0_i32_0 = arith.constant 0 : i32
    return %arg0, %c0_i32 : i32, i32
  }
  func.func @transform_2(%arg0: i32) -> (i32, i32) {
    %c0_i32 = arith.constant 0 : i32
    %c0_i32_0 = arith.constant 0 : i32
    return %arg0, %c0_i32 : i32, i32
  }
}

</mosaic_0001>

<bundles_post_ra>
// kernel: bce_with_logits_loss.1
= control target key start
LH: loop header
LB: loop body
LE: loop exit
PB: predicated region body
PF: predicated region fallthrough
CT: control target
= control target key end

     0   :  { %s287_s9 = smov 0   ;;  %s307_s0 = inlined_call_operand.vmem [shape: f32[16,128], index: 0, kind: input, shape index: {}]   ;;  %s308_s1 = inlined_call_operand.vmem [shape: f32[16,128], index: 1, kind: input, shape index: {}]   ;;  %s309_s2 = inlined_call_operand.vmem [shape: f32[16,128], index: 2, kind: output, shape index: {}]  }
   0x1 LB: > { %s242_s10 = sadd.s32 4294967295, %s270_s9   ;;  %p246_p0 = scmp.ge.s32.totalorder %s270_s9, 1  ;;  %s270_s9 = sphi %s287_s9, %s12_s9  }
   0x2   : > { %p120_p1 = scmp.lt.s32.totalorder %s270_s9, 3 }
   0x4   : > { %p121_p2 = pnand %p246_p0, %p120_p1 }
   0x5   : > { %p144_p3 = scmp.lt.s32.totalorder (!%p121_p2), %s242_s10, 1 }
   0x6   : > { %124 = sbr.rel (%p121_p2) target bundleno = 53 (0x35), region = 28 }
   0xd   : > { %s311_s10 = smov (!%p144_p3, %s242_s10), 1 }
   0xe   : > { %s247_s11 = sshll.u32 %s311_s10, 3 }
   0xf   : > { %s147_s14 = scalar_lea.vmem %s307_s0, %s247_s11  ;;  %s151_s17 = scalar_lea.vmem %s308_s1, %s247_s11 }
  0x10   : > { %v156_v0 = vld [vmem:[%s147_s14] sm:$0xff]  ;;  %s155_s20 = scalar_lea.vmem %s309_s2, %s247_s11 }
  0x11   : > { %v161_v1 = vand.u32 2147483647, %v156_v0  ;;  %v157_v7 = vld [vmem:[%s151_s17] sm:$0xff]  ;;  %v158_v9 = vmax.f32 %v156_v0, 0.0 }
  0x12   : > { %v159_v10 = vmul.f32 %v157_v7, %v156_v0 }
  0x13   : > { %v162_v2 = vsub.f32 0.0, %v161_v1 }
  0x14   : > { %v160_v14 = vsub.f32 %v158_v9, %v159_v10 }
  0x15   : > { %v163_v3 = vmul.f32 1.442695, %v162_v2 }
  0x17   : > { %260 = vpow2.f32 %v163_v3 }
  0x21   : > { %v261_v4 = vpop.eup %260 }
  0x22   : > { %v165_v5 = vadd.f32 1.0, %v261_v4  ;;  %v168_v6 = vmul.f32 -0.5, %v261_v4  ;;  %v171_v11 = vand.u32 2147483647, %v261_v4 }
  0x24   : > { %262 = vlog2.f32 %v165_v5  ;;  %v169_v8 = vadd.f32 1.0, %v168_v6  ;;  %vm172_vm0 = vcmp.lt.f32.partialorder %v171_v11, 0.0004427343 }
  0x26   : > { %v170_v12 = vmul.f32 %v261_v4, %v169_v8 }
  0x2e   : > { %v263_v13 = vpop.eup %262 }
  0x2f   : > { %v167_v15 = vmul.f32 0.6931472, %v263_v13 }
  0x31   : > { %v173_v16 = vsel %vm172_vm0, %v170_v12, %v167_v15 }
  0x32   : > { %v174_v17 = vadd.f32 %v173_v16, %v160_v14 }
  0x34   : > { %176 = vst [vmem:[%s155_s20] sm:$0xff] %v174_v17 }
  0x35 PF: > { %s12_s9 = sadd.s32 1, %s270_s9  }
  0x36   : > { %p9_p4 = scmp.ge.s32.totalorder %s12_s9, 4  }
  0x38   :  { %11 = sbr.rel (!%p9_p4) target bundleno = 1 (0x1), region = 61 }

</bundles_post_ra>
